<compile_context>
chip_gen: v5e
topology: v5e:2x2
jax: 0.10.0
libtpu: 0.0.40
codegen_flags: <defaults>
</compile_context>

<pallas_src>
import functools

import jax
import jax.numpy as jnp
from jax.experimental import pallas as pl
from jax.experimental.pallas import tpu as pltpu


_TARGET_BLOCK_BYTES = 2 * 1024 * 1024   # ~2 MiB input blocks (roofline sweet spot,
                                        # safe w/ double-buffering on v5e/v6e/v7x)
_HW_SINGLE_MAX = 2048                   # above this, also tile the spatial axis
_SPATIAL_TILE = 2048                    # spatial tile width (multiple of 128)
_VMEM_LIMIT_BYTES = 32 * 1024 * 1024    # explicit scoped-VMEM budget (safe on all gens)


def _round_up(x, m):
    return ((x + m - 1) // m) * m


def _pick_row_tile(rows, bytes_per_row, target_bytes=_TARGET_BLOCK_BYTES, cap=4096):
    """Row-tile height: multiple of 8, ~target_bytes per block, capped."""
    if rows <= 8:
        return rows  # full-dim block satisfies the (8, .) tiling constraint
    tm = target_bytes // max(1, bytes_per_row)
    tm = max(8, min(cap, (tm // 8) * 8))
    return min(tm, _round_up(rows, 8))


def _pool_rows_kernel(x_ref, max_ref, avg_ref, *, inv_hw):
    # x_ref: (TM, H*W) block; reduce the full spatial axis in one shot (f32 acc).
    x = x_ref[...].astype(jnp.float32)
    max_ref[...] = jnp.max(x, axis=1, keepdims=True).astype(max_ref.dtype)
    avg_ref[...] = (jnp.sum(x, axis=1, keepdims=True) * inv_hw).astype(avg_ref.dtype)


def _pool_rows_tiled_kernel(x_ref, max_ref, avg_ref, mx_acc, sum_acc, *,
                            hw, tk, inv_hw, needs_mask):
    # Grid: (row_blocks, spatial_blocks); spatial axis is the reduction axis.
    k = pl.program_id(1)

    @pl.when(k == 0)
    def _():
        mx_acc[...] = jnp.full_like(mx_acc, -jnp.inf)
        sum_acc[...] = jnp.zeros_like(sum_acc)

    x = x_ref[...].astype(jnp.float32)
    if needs_mask:
        # Last spatial tile is padded; mask padded lanes (-inf for max, 0 for sum).
        lane = jax.lax.broadcasted_iota(jnp.int32, x.shape, 1) + k * tk
        valid = lane < hw
        x_max = jnp.where(valid, x, -jnp.inf)
        x_sum = jnp.where(valid, x, 0.0)
    else:
        x_max, x_sum = x, x

    mx_acc[...] = jnp.maximum(mx_acc[...], jnp.max(x_max, axis=1, keepdims=True))
    sum_acc[...] = sum_acc[...] + jnp.sum(x_sum, axis=1, keepdims=True)

    @pl.when(k == pl.num_programs(1) - 1)
    def _():
        max_ref[...] = mx_acc[...].astype(max_ref.dtype)
        avg_ref[...] = (sum_acc[...] * inv_hw).astype(avg_ref.dtype)


def adaptive_concat_pool2d(x):
    """x: (N, C, H, W) -> (N, 2*C, 1, 1), matching torch.cat([mp(x), ap(x)], 1)."""
    # TODO(synk): general output_size != 1 (true adaptive windows) not implemented;
    # this covers the module's default sz=None -> 1 path used in the backbone head.
    N, C, H, W = x.shape
    rows, hw = N * C, H * W
    xf = x.reshape(rows, hw)
    itemsize = jnp.dtype(x.dtype).itemsize
    inv_hw = 1.0 / float(hw)

    out_shape = (jax.ShapeDtypeStruct((rows, 1), x.dtype),
                 jax.ShapeDtypeStruct((rows, 1), x.dtype))

    if hw <= _HW_SINGLE_MAX:
        # Single spatial block per row-tile; grid only over rows.
        tm = _pick_row_tile(rows, hw * itemsize)
        mx, av = pl.pallas_call(
            functools.partial(_pool_rows_kernel, inv_hw=inv_hw),
            out_shape=out_shape,
            grid=(pl.cdiv(rows, tm),),
            in_specs=[pl.BlockSpec((tm, hw), lambda i: (i, 0))],
            out_specs=(pl.BlockSpec((tm, 1), lambda i: (i, 0)),
                       pl.BlockSpec((tm, 1), lambda i: (i, 0))),
            compiler_params=pltpu.CompilerParams(
                dimension_semantics=("parallel",),
                vmem_limit_bytes=_VMEM_LIMIT_BYTES),
        )(xf)
    else:
        # Tile both rows and the spatial (reduction) axis; accumulate in VMEM scratch.
        tk = _SPATIAL_TILE
        tm = _pick_row_tile(rows, tk * itemsize)
        needs_mask = (hw % tk) != 0
        mx, av = pl.pallas_call(
            functools.partial(_pool_rows_tiled_kernel, hw=hw, tk=tk,
                              inv_hw=inv_hw, needs_mask=needs_mask),
            out_shape=out_shape,
            grid=(pl.cdiv(rows, tm), pl.cdiv(hw, tk)),
            in_specs=[pl.BlockSpec((tm, tk), lambda i, k: (i, k))],
            out_specs=(pl.BlockSpec((tm, 1), lambda i, k: (i, 0)),
                       pl.BlockSpec((tm, 1), lambda i, k: (i, 0))),
            scratch_shapes=[pltpu.VMEM((tm, 1), jnp.float32),
                            pltpu.VMEM((tm, 1), jnp.float32)],
            compiler_params=pltpu.CompilerParams(
                dimension_semantics=("parallel", "arbitrary"),
                vmem_limit_bytes=_VMEM_LIMIT_BYTES),
        )(xf)

    mx = mx.reshape(N, C, 1, 1)
    av = av.reshape(N, C, 1, 1)
    # Channel concat: max-pooled channels first, then avg-pooled channels.
    return jnp.concatenate([mx, av], axis=1)


if __name__ == "__main__":
    key = jax.random.PRNGKey(0)
    k1, k2 = jax.random.split(key)

    # Small shape consistent with the module (single-spatial-block path).
    N, C, H, W = 2, 4, 16, 16
    x = jax.random.normal(k1, (N, C, H, W), dtype=jnp.float32)
    out = jax.block_until_ready(adaptive_concat_pool2d(x))
    ref = jnp.concatenate([jnp.max(x, axis=(2, 3), keepdims=True),
                           jnp.mean(x, axis=(2, 3), keepdims=True)], axis=1)
    assert out.shape == (N, 2 * C, 1, 1), out.shape
    assert out.dtype == x.dtype, out.dtype
    assert jnp.allclose(out, ref, atol=1e-5, rtol=1e-5)

    # Larger feature map: exercises the spatial-tiled accumulator path,
    # including the masked partial last spatial tile (5120 % 2048 != 0).
    N2, C2, H2, W2 = 2, 8, 64, 80
    x2 = jax.random.normal(k2, (N2, C2, H2, W2), dtype=jnp.float32)
    out2 = jax.block_until_ready(adaptive_concat_pool2d(x2))
    ref2 = jnp.concatenate([jnp.max(x2, axis=(2, 3), keepdims=True),
                            jnp.mean(x2, axis=(2, 3), keepdims=True)], axis=1)
    assert out2.shape == (N2, 2 * C2, 1, 1), out2.shape
    assert jnp.allclose(out2, ref2, atol=1e-5, rtol=1e-5)

    print("KERNEL_OK")
</pallas_src>

<mosaic_0001>
module attributes {stable_mosaic.version = 11 : i64} {
  func.func @_pool_rows_kernel(%arg0: i32, %arg1: memref<8x256xf32, #tpu.memory_space<vmem>>, %arg2: memref<8x1xf32, #tpu.memory_space<vmem>>, %arg3: memref<8x1xf32, #tpu.memory_space<vmem>>) attributes {dimension_semantics = [#tpu.dimension_semantics<parallel>], iteration_bounds = array<i64: 1>, scalar_prefetch = 0 : i64, scratch_operands = 0 : i64, tpu.core_type = #tpu.core_type<tc>, window_params = [{transform_indices = @transform_0, window_bounds = array<i64: 8, 256>}, {transform_indices = @transform_1, window_bounds = array<i64: 8, 1>}, {transform_indices = @transform_2, window_bounds = array<i64: 8, 1>}]} {
    %c0 = arith.constant 0 : index
    %c0_0 = arith.constant 0 : index
    %0 = vector.load %arg1[%c0, %c0_0] : memref<8x256xf32, #tpu.memory_space<vmem>>, vector<8x256xf32>
    %cst = arith.constant dense<0xFF800000> : vector<8xf32>
    %1 = vector.multi_reduction <maximumf>, %0, %cst [1] : vector<8x256xf32> to vector<8xf32>
    %2 = vector.shape_cast %1 : vector<8xf32> to vector<8x1xf32>
    %c0_1 = arith.constant 0 : index
    %c0_2 = arith.constant 0 : index
    %3 = vector.load %arg2[%c0_1, %c0_2] : memref<8x1xf32, #tpu.memory_space<vmem>>, vector<8x1xf32>
    tpu.vector_store %arg2[%c0_1, %c0_2], %2 {strides = array<i32>} : memref<8x1xf32, #tpu.memory_space<vmem>>, vector<8x1xf32>,
    %cst_3 = arith.constant dense<0.000000e+00> : vector<8xf32>
    %4 = vector.multi_reduction <add>, %0, %cst_3 [1] : vector<8x256xf32> to vector<8xf32>
    %5 = vector.shape_cast %4 : vector<8xf32> to vector<8x1xf32>
    %cst_4 = arith.constant 3.906250e-03 : f32
    %6 = vector.broadcast %cst_4 : f32 to vector<8x1xf32>
    %7 = arith.mulf %5, %6 : vector<8x1xf32>
    %c0_5 = arith.constant 0 : index
    %c0_6 = arith.constant 0 : index
    %8 = vector.load %arg3[%c0_5, %c0_6] : memref<8x1xf32, #tpu.memory_space<vmem>>, vector<8x1xf32>
    tpu.vector_store %arg3[%c0_5, %c0_6], %7 {strides = array<i32>} : memref<8x1xf32, #tpu.memory_space<vmem>>, vector<8x1xf32>,
    return
  }
  func.func @transform_0(%arg0: i32) -> (i32, i32) {
    %c0_i32 = arith.constant 0 : i32
    %c0_i32_0 = arith.constant 0 : i32
    return %arg0, %c0_i32 : i32, i32
  }
  func.func @transform_1(%arg0: i32) -> (i32, i32) {
    %c0_i32 = arith.constant 0 : i32
    %c0_i32_0 = arith.constant 0 : i32
    return %arg0, %c0_i32 : i32, i32
  }
  func.func @transform_2(%arg0: i32) -> (i32, i32) {
    %c0_i32 = arith.constant 0 : i32
    %c0_i32_0 = arith.constant 0 : i32
    return %arg0, %c0_i32 : i32, i32
  }
}

</mosaic_0001>

<bundles_post_ra>
// kernel: tpu_custom_call.1
= control target key start
LH: loop header
LB: loop body
LE: loop exit
PB: predicated region body
PF: predicated region fallthrough
CT: control target
= control target key end

     0   :  { %8 = vsyncpa [#allocation3], 0  ;;  %s72_s12 = smov [#allocation2]   ;;  %s97_s0 = inlined_call_operand.hbm [shape: f32[8,256], index: 0, kind: input, shape index: {}]   ;;  %s98_s1 = inlined_call_operand.vmem [shape: f32[8,1], index: 1, kind: output, shape index: {0}]   ;;  %s99_s2 = inlined_call_operand.vmem [shape: f32[8,1], index: 2, kind: output, shape index: {1}]  }
   0x1   :  { %s14_s11 = sshll.u32 %s97_s0, 4  ;;  %s16_s13 = sshll.u32 %s72_s12, 4  ;;  %s15_s11 = int_to_ptr.hbm [resolvable:$true] %s14_s11  ;;  %s17_s13 = int_to_ptr.vmem [resolvable:$true] %s16_s13 }
   0x2   :  { %19 = dma.hbm_to_vmem [thread:$0]  %s15_s11, 256, %s17_s13, [#allocation3]  }
   0x3   :  { %70 = dma.done.wait [#allocation3], 256  }
   0x4   :  { %71 = vsyncadd [#allocation3], 4294967040  ;;  %v24_v0 = vld [vmem:[#allocation2] sm:$0xff]  ;;  %v25_v1 = vld [vmem:[#allocation2 + $0x8] sm:$0xff]  ;;  %vm29_vm0 = vcmask 7168  }
   0x5   :  { %v31_v2 = vadd.f32 %v25_v1, %v24_v0  ;;  %v26_v3 = vmax.f32 %v24_v0, %v25_v1 }
   0x7   :  { %32 = vadd.xlane.f32.xlu0 %v31_v2 }
   0xf   :  { %27 = vmax.xlane.f32.xlu0 %v26_v3 }
  0x7a   :  { %v33_v4 = vpop.xlane.xlu0 %32 }
  0x7b   :  { %v34_v5 = vmul.f32 0.00390625, %v33_v4 }
  0x7d   :  { %35 = vst.msk [vmem:[%s99_s2] sm:$0xff] %vm29_vm0, %v34_v5 }
  0x82   :  { %v28_v6 = vpop.xlane.xlu0 %27 }
  0x83   :  { %30 = vst.msk [vmem:[%s98_s1] sm:$0xff] %vm29_vm0, %v28_v6 }
  0x84   :  { %44 = vsyncpa [#allocation3], 1 }

</bundles_post_ra>
